<compile_context>
chip_gen: v6e
topology: v6e:2x2x1
jax: 0.10.0
libtpu: 0.0.40
codegen_flags: <defaults>
</compile_context>

<pallas_src>
import functools
import numpy as np
import jax
import jax.numpy as jnp
from jax.experimental import pallas as pl
from jax.experimental.pallas import tpu as pltpu


def _round_up(x, m):
    return ((x + m - 1) // m) * m


def _cdiv(a, b):
    return -(-a // b)


# ----------------------------------------------------------------------------
# Deterministic parameter construction (librosa-style HTK mel filterbank with
# slaney normalization), periodic Hann window, fused windowed real-DFT basis.
# ----------------------------------------------------------------------------
def _hz_to_mel_htk(f):
    return 2595.0 * np.log10(1.0 + np.asarray(f, dtype=np.float64) / 700.0)


def _mel_to_hz_htk(m):
    return 700.0 * (10.0 ** (np.asarray(m, dtype=np.float64) / 2595.0) - 1.0)


def mel_filterbank(sr, n_fft, n_mels, fmin=0.0, fmax=None):
    """librosa.filters.mel(..., htk=True, norm='slaney') reimplementation."""
    if fmax is None:
        fmax = sr / 2.0
    n_freq = n_fft // 2 + 1
    fftfreqs = np.linspace(0.0, sr / 2.0, n_freq)
    mel_pts = np.linspace(_hz_to_mel_htk(fmin), _hz_to_mel_htk(fmax), n_mels + 2)
    hz_pts = _mel_to_hz_htk(mel_pts)
    fdiff = np.diff(hz_pts)
    ramps = hz_pts[:, None] - fftfreqs[None, :]
    weights = np.zeros((n_mels, n_freq), dtype=np.float64)
    for i in range(n_mels):
        lower = -ramps[i] / fdiff[i]
        upper = ramps[i + 2] / fdiff[i + 1]
        weights[i] = np.maximum(0.0, np.minimum(lower, upper))
    enorm = 2.0 / (hz_pts[2:n_mels + 2] - hz_pts[:n_mels])
    weights *= enorm[:, None]
    return weights.astype(np.float32)


def hann_window(win_length):
    # torch.hann_window default is periodic=True
    n = np.arange(win_length, dtype=np.float64)
    return 0.5 * (1.0 - np.cos(2.0 * np.pi * n / win_length))


def fused_windowed_dft_basis(n_fft, win_length, n_freq_pad):
    """(n_fft, 2*n_freq_pad) matrix: [ win*cos | zeros | win*(-sin) | zeros ].

    The Hann window is folded into the DFT basis so the kernel never performs
    a per-frame window multiply.  If win_length < n_fft the window is centered
    and zero-padded, matching torch.stft semantics.
    """
    n_freq = n_fft // 2 + 1
    win = hann_window(win_length)
    if win_length < n_fft:
        lpad = (n_fft - win_length) // 2
        win = np.pad(win, (lpad, n_fft - win_length - lpad))
    elif win_length > n_fft:
        raise ValueError("win_length > n_fft is not supported")
    n = np.arange(n_fft, dtype=np.float64)[:, None]
    k = np.arange(n_freq, dtype=np.float64)[None, :]
    ang = 2.0 * np.pi * n * k / n_fft
    basis = np.zeros((n_fft, 2 * n_freq_pad), dtype=np.float32)
    basis[:, :n_freq] = win[:, None] * np.cos(ang)
    basis[:, n_freq_pad:n_freq_pad + n_freq] = win[:, None] * (-np.sin(ang))
    return basis


# ----------------------------------------------------------------------------
# Pallas kernel: in-VMEM frame assembly + windowed-DFT matmul + magnitude +
# mel matmul + log-clamp, one frame tile per grid step.
# ----------------------------------------------------------------------------
def _melspec_kernel(x_ref, y_ref, basis_ref, melT_ref, o_ref, *,
                    n_chunks, hop, n_fft, tile_m, n_freq_pad, clamp):
    # x_ref: (tile_m, hop) rows of the hop-reshaped padded audio (this tile).
    # y_ref: (tile_m, hop) rows of the NEXT tile (only its first n_chunks-1
    #        rows are needed to complete the last overlapping frames).
    cdt = basis_ref.dtype
    x = x_ref[...].astype(cdt)                                     # (tile_m, hop)
    if n_chunks > 1:
        y_head = y_ref[0:n_chunks - 1, :].astype(cdt)              # (C-1, hop)
        sl = jnp.concatenate([x, y_head], axis=0)                  # (tile_m+C-1, hop)
        cols = []
        for e in range(n_chunks):
            w = min(hop, n_fft - e * hop)
            cols.append(sl[e:e + tile_m, :w])
        frames = jnp.concatenate(cols, axis=1)                     # (tile_m, n_fft)
    else:
        frames = x[:, :n_fft]

    # One wide MXU matmul produces [real | imag] (f32 accumulation).
    spec = jnp.dot(frames, basis_ref[...], preferred_element_type=jnp.float32)
    re = spec[:, :n_freq_pad]                                      # lane-aligned slices
    im = spec[:, n_freq_pad:]
    mag = jnp.sqrt(re * re + im * im)                              # EUP
    mel = jnp.dot(mag.astype(melT_ref.dtype), melT_ref[...],
                  preferred_element_type=jnp.float32)
    o_ref[...] = jnp.log(jnp.maximum(mel, clamp)).astype(o_ref.dtype)


class MelSpectrogramPallas:
    def __init__(self, is_half, n_mel_channels, sample_rate, win_length, hop_length,
                 n_fft=None, mel_fmin=0.0, mel_fmax=None, clamp=1e-5,
                 compute_dtype=jnp.bfloat16, tile_m=None):
        n_fft = win_length if n_fft is None else n_fft
        self.n_fft = n_fft
        self.win_length = win_length
        self.hop_length = hop_length
        self.sample_rate = sample_rate
        self.n_mel_channels = n_mel_channels
        self.clamp = float(clamp)
        self.is_half = is_half
        self.compute_dtype = compute_dtype

        self.n_freq = n_fft // 2 + 1
        self.n_freq_pad = _round_up(self.n_freq, 128)   # lane-dense matmul N dims
        self.n_mel_pad = _round_up(n_mel_channels, 128)
        self.n_chunks = _cdiv(n_fft, hop_length)        # hop-rows per frame (ceil)

        mel_np = mel_filterbank(sample_rate, n_fft, n_mel_channels, mel_fmin, mel_fmax)
        basis_np = fused_windowed_dft_basis(n_fft, win_length, self.n_freq_pad)
        # bf16 operands (default) -> native MXU throughput, f32 accumulation.
        self.basis = jnp.asarray(basis_np).astype(compute_dtype)
        melT_np = np.zeros((self.n_freq_pad, self.n_mel_pad), dtype=np.float32)
        melT_np[:self.n_freq, :n_mel_channels] = mel_np.T
        self.melT = jnp.asarray(melT_np).astype(compute_dtype)

        # Generation-aware defaults: big tiles on 128-MiB-VMEM chips (v5e/v6e),
        # smaller on 64-MiB v7x; VMEM requests capped at 75% of physical.
        try:
            vmem_cap = int(pltpu.get_tpu_info().vmem_capacity_bytes)
        except Exception:
            vmem_cap = 64 << 20                          # conservative fallback
        self._vmem_cap = (vmem_cap * 3) // 4
        if tile_m is None:
            tile_m = 512 if vmem_cap > (96 << 20) else 256
        self.tile_m = int(tile_m)
        self._fancy_ok = None   # Buffered(1)/cost_estimate support, probed on 1st call

    def _vmem_limit_bytes(self, tile_m, out_itemsize):
        cds = jnp.dtype(self.compute_dtype).itemsize
        nfp, nmp = self.n_freq_pad, self.n_mel_pad
        n_fft, hop, C = self.n_fft, self.hop_length, self.n_chunks
        est = (4 * tile_m * hop * 4                 # x + y audio blocks (double buf)
               + 2 * tile_m * nmp * out_itemsize    # output (double buf)
               + n_fft * 2 * nfp * cds              # resident DFT basis
               + nfp * nmp * cds                    # resident mel basis
               + (tile_m + C) * hop * cds           # slab value
               + 2 * tile_m * n_fft * cds           # assembled frame tile (+staging)
               + 2 * tile_m * 2 * nfp * 4           # spec
               + tile_m * nfp * 4)                  # magnitude
        est = int(est * 1.25) + (2 << 20)
        if est <= (16 << 20):
            return None                             # defaults are fine
        return min(est, self._vmem_cap)

    def __call__(self, audio):
        # audio: (B, T) float32 (keyshift=0, speed=1, center=True semantics).
        audio = jnp.asarray(audio, jnp.float32)
        if audio.ndim == 1:
            audio = audio[None, :]
        B, T = audio.shape
        n_fft, hop, C = self.n_fft, self.hop_length, self.n_chunks
        pad = n_fft // 2
        padded = jnp.pad(audio, ((0, 0), (pad, pad)), mode="reflect")
        padded_len = T + 2 * pad
        n_frames = 1 + (padded_len - n_fft) // hop

        # ---- frame-tile size; keep the grid >= 2 steps when possible --------
        tile_m = min(self.tile_m, _round_up(n_frames, 8))
        if B == 1 and n_frames >= 16 and _round_up(n_frames, tile_m) // tile_m < 2:
            tile_m = _round_up(_cdiv(n_frames, 2), 8)
        tile_m = max(tile_m, _round_up(max(C - 1, 8), 8))
        f_pad = _round_up(n_frames, tile_m)
        n_tiles = f_pad // tile_m

        # ---- contiguous non-overlapping (rows, hop) layout of padded audio --
        # (replaces the old HBM frame gather: no ~n_fft/hop redundancy)
        rows_needed = _cdiv(padded_len, hop)
        R_total = max((n_tiles + 1) * tile_m, _round_up(rows_needed, tile_m))
        S_total = R_total * hop
        audio3 = jnp.pad(padded, ((0, 0), (0, S_total - padded_len)))
        audio3 = audio3.reshape(B, R_total, hop)

        out_dtype = jnp.bfloat16 if self.is_half else jnp.float32
        out_itemsize = jnp.dtype(out_dtype).itemsize
        nfp, nmp = self.n_freq_pad, self.n_mel_pad
        kernel = functools.partial(
            _melspec_kernel, n_chunks=C, hop=hop, n_fft=n_fft, tile_m=tile_m,
            n_freq_pad=nfp, clamp=self.clamp)

        flops = 2 * B * f_pad * (n_fft * 2 * nfp + nfp * nmp)
        transc = B * f_pad * (nfp + nmp)
        bytes_acc = (2 * int(audio3.size) * 4
                     + int(self.basis.size) * self.basis.dtype.itemsize
                     + int(self.melT.size) * self.melT.dtype.itemsize
                     + B * f_pad * nmp * out_itemsize)
        vmem_limit = self._vmem_limit_bytes(tile_m, out_itemsize)

        def run(fancy):
            const_kw = {"pipeline_mode": pl.Buffered(1)} if fancy else {}
            in_specs = [
                # Streamed audio row blocks (double-buffered by the pipeline).
                pl.BlockSpec((None, tile_m, hop), lambda b, i: (b, i, 0)),
                pl.BlockSpec((None, tile_m, hop), lambda b, i: (b, i + 1, 0)),
                # Constant blocks: same index every step -> resident in VMEM.
                pl.BlockSpec((n_fft, 2 * nfp), lambda b, i: (0, 0), **const_kw),
                pl.BlockSpec((nfp, nmp), lambda b, i: (0, 0), **const_kw),
            ]
            out_spec = pl.BlockSpec((None, tile_m, nmp), lambda b, i: (b, i, 0))
            extra = {}
            if fancy:
                extra["cost_estimate"] = pl.CostEstimate(
                    flops=int(flops), transcendentals=int(transc),
                    bytes_accessed=int(bytes_acc))
            return pl.pallas_call(
                kernel,
                out_shape=jax.ShapeDtypeStruct((B, f_pad, nmp), out_dtype),
                grid=(B, n_tiles),
                in_specs=in_specs,
                out_specs=out_spec,
                compiler_params=pltpu.CompilerParams(
                    dimension_semantics=("parallel", "parallel"),
                    vmem_limit_bytes=vmem_limit),
                **extra,
            )(audio3, audio3, self.basis, self.melT)

        if self._fancy_ok is None:
            try:
                out = run(True)
                self._fancy_ok = True
            except Exception:
                self._fancy_ok = False
                out = run(False)
        else:
            out = run(self._fancy_ok)

        mel = out[:, :n_frames, :self.n_mel_channels]
        # TODO(synk): emitting the output pre-transposed from the kernel would
        # drop this small XLA transpose, but would require an in-kernel XLU
        # transpose of the magnitude tile; kept outside (cheaper overall).
        return jnp.transpose(mel, (0, 2, 1))        # (B, n_mels, n_frames)


# ----------------------------------------------------------------------------
# Pure-JAX reference (jnp.fft.rfft) for correctness checks.
# ----------------------------------------------------------------------------
def reference_melspec(sample_rate, n_mel_channels, win_length, hop_length, audio,
                      n_fft=None, clamp=1e-5, mel_fmin=0.0, mel_fmax=None):
    n_fft = win_length if n_fft is None else n_fft
    audio = jnp.asarray(audio, jnp.float32)
    pad = n_fft // 2
    padded = jnp.pad(audio, ((0, 0), (pad, pad)), mode="reflect")
    n_frames = 1 + (padded.shape[1] - n_fft) // hop_length
    idx = jnp.arange(n_frames)[:, None] * hop_length + jnp.arange(n_fft)[None, :]
    frames = padded[:, idx]                                        # (B, F, n_fft)
    win = jnp.asarray(hann_window(win_length).astype(np.float32))
    if win_length < n_fft:
        lpad = (n_fft - win_length) // 2
        win = jnp.pad(win, (lpad, n_fft - win_length - lpad))
    fft = jnp.fft.rfft(frames * win[None, None, :], n=n_fft, axis=-1)
    mag = jnp.abs(fft)
    mel_w = jnp.asarray(mel_filterbank(sample_rate, n_fft, n_mel_channels,
                                       mel_fmin, mel_fmax))
    mel = jnp.einsum("mf,bnf->bmn", mel_w, mag)                    # (B, n_mels, F)
    return jnp.log(jnp.clip(mel, clamp, None))


if __name__ == "__main__":
    # Small, module-consistent shapes.
    sample_rate = 16000
    n_mel_channels = 32
    win_length = 64        # n_fft = 64 -> n_freq = 33 (padded to 128)
    hop_length = 16
    B, T = 2, 240          # n_frames = 1 + T // hop = 16

    key = jax.random.PRNGKey(0)
    audio = jax.random.normal(key, (B, T), dtype=jnp.float32)

    ref = jax.block_until_ready(
        reference_melspec(sample_rate, n_mel_channels, win_length, hop_length, audio))

    # Fast path: bf16 MXU operands, f32 accumulation (loose log-domain check).
    mod = MelSpectrogramPallas(
        is_half=False, n_mel_channels=n_mel_channels, sample_rate=sample_rate,
        win_length=win_length, hop_length=hop_length)
    out = jax.block_until_ready(mod(audio))
    assert out.shape == (B, n_mel_channels, 1 + T // hop_length), out.shape
    diff = np.abs(np.asarray(out) - np.asarray(ref))
    assert float(np.mean(diff)) < 2e-2, ("bf16 mean abs err", float(np.mean(diff)))
    assert float(np.max(diff)) < 1.0, ("bf16 max abs err", float(np.max(diff)))

    # Exact path: f32 operands everywhere (tight check of the framing / math).
    mod32 = MelSpectrogramPallas(
        is_half=False, n_mel_channels=n_mel_channels, sample_rate=sample_rate,
        win_length=win_length, hop_length=hop_length, compute_dtype=jnp.float32)
    out32 = jax.block_until_ready(mod32(audio))
    np.testing.assert_allclose(np.asarray(out32), np.asarray(ref), rtol=2e-3, atol=2e-3)

    print("KERNEL_OK")
</pallas_src>

<mosaic_0001>
module attributes {stable_mosaic.version = 11 : i64} {
  func.func @_melspec_kernel(%arg0: i32, %arg1: i32, %arg2: memref<1x16x16xf32, #tpu.memory_space<vmem>>, %arg3: memref<1x16x16xf32, #tpu.memory_space<vmem>>, %arg4: memref<64x256xbf16, #tpu.memory_space<vmem>>, %arg5: memref<128x128xbf16, #tpu.memory_space<vmem>>, %arg6: memref<1x16x128xf32, #tpu.memory_space<vmem>>) attributes {dimension_semantics = [#tpu.dimension_semantics<parallel>, #tpu.dimension_semantics<parallel>], iteration_bounds = array<i64: 2, 1>, scalar_prefetch = 0 : i64, scratch_operands = 0 : i64, tpu.core_type = #tpu.core_type<tc>, window_params = [{transform_indices = @transform_0, window_bounds = array<i64: 1, 16, 16>}, {transform_indices = @transform_1, window_bounds = array<i64: 1, 16, 16>}, {pipeline_mode = #tpu.pipeline_mode<synchronous>, transform_indices = @transform_2, window_bounds = array<i64: 64, 256>}, {pipeline_mode = #tpu.pipeline_mode<synchronous>, transform_indices = @transform_3, window_bounds = array<i64: 128, 128>}, {transform_indices = @transform_4, window_bounds = array<i64: 1, 16, 128>}]} {
    %c0 = arith.constant 0 : index
    %c0_0 = arith.constant 0 : index
    %c0_1 = arith.constant 0 : index
    %0 = vector.load %arg2[%c0, %c0_0, %c0_1] : memref<1x16x16xf32, #tpu.memory_space<vmem>>, vector<1x16x16xf32>
    %1 = vector.shape_cast %0 : vector<1x16x16xf32> to vector<16x16xf32>
    %2 = arith.truncf %1 : vector<16x16xf32> to vector<16x16xbf16>
    %c0_2 = arith.constant 0 : index
    %c0_3 = arith.constant 0 : index
    %c0_4 = arith.constant 0 : index
    %3 = vector.load %arg3[%c0_2, %c0_3, %c0_4] : memref<1x16x16xf32, #tpu.memory_space<vmem>>, vector<1x3x16xf32>
    %4 = vector.shape_cast %3 : vector<1x3x16xf32> to vector<3x16xf32>
    %5 = arith.truncf %4 : vector<3x16xf32> to vector<3x16xbf16>
    %6 = tpu.concatenate %2, %5 in 0 : vector<16x16xbf16>, vector<3x16xbf16> -> vector<19x16xbf16>
    %7 = vector.extract_strided_slice %6 {offsets = [0, 0], sizes = [16, 16], strides = [1, 1]} : vector<19x16xbf16> to vector<16x16xbf16>
    %8 = vector.extract_strided_slice %6 {offsets = [1, 0], sizes = [16, 16], strides = [1, 1]} : vector<19x16xbf16> to vector<16x16xbf16>
    %9 = vector.extract_strided_slice %6 {offsets = [2, 0], sizes = [16, 16], strides = [1, 1]} : vector<19x16xbf16> to vector<16x16xbf16>
    %10 = vector.extract_strided_slice %6 {offsets = [3, 0], sizes = [16, 16], strides = [1, 1]} : vector<19x16xbf16> to vector<16x16xbf16>
    %11 = tpu.concatenate %7, %8, %9, %10 in 1 : vector<16x16xbf16>, vector<16x16xbf16>, vector<16x16xbf16>, vector<16x16xbf16> -> vector<16x64xbf16>
    %c0_5 = arith.constant 0 : index
    %c0_6 = arith.constant 0 : index
    %12 = vector.load %arg4[%c0_5, %c0_6] : memref<64x256xbf16, #tpu.memory_space<vmem>>, vector<64x256xbf16>
    %cst = arith.constant dense<0.000000e+00> : vector<16x256xf32>
    %13 = tpu.matmul %11, %12, %cst {dimension_numbers = #tpu.dot_dimension_numbers<[1], [0], [0], [1], [0, 0, 1, 1], [], []>} : vector<16x64xbf16>, vector<64x256xbf16>, vector<16x256xf32> -> vector<16x256xf32>
    %14 = vector.extract_strided_slice %13 {offsets = [0, 0], sizes = [16, 128], strides = [1, 1]} : vector<16x256xf32> to vector<16x128xf32>
    %15 = vector.extract_strided_slice %13 {offsets = [0, 128], sizes = [16, 128], strides = [1, 1]} : vector<16x256xf32> to vector<16x128xf32>
    %16 = arith.mulf %14, %14 : vector<16x128xf32>
    %17 = arith.mulf %15, %15 : vector<16x128xf32>
    %18 = arith.addf %16, %17 : vector<16x128xf32>
    %19 = math.sqrt %18 : vector<16x128xf32>
    %20 = arith.truncf %19 : vector<16x128xf32> to vector<16x128xbf16>
    %c0_7 = arith.constant 0 : index
    %c0_8 = arith.constant 0 : index
    %21 = vector.load %arg5[%c0_7, %c0_8] : memref<128x128xbf16, #tpu.memory_space<vmem>>, vector<128x128xbf16>
    %cst_9 = arith.constant dense<0.000000e+00> : vector<16x128xf32>
    %22 = tpu.matmul %20, %21, %cst_9 {dimension_numbers = #tpu.dot_dimension_numbers<[1], [0], [0], [1], [0, 0, 1, 1], [], []>} : vector<16x128xbf16>, vector<128x128xbf16>, vector<16x128xf32> -> vector<16x128xf32>
    %cst_10 = arith.constant 9.99999974E-6 : f32
    %23 = vector.broadcast %cst_10 : f32 to vector<16x128xf32>
    %24 = arith.maximumf %22, %23 : vector<16x128xf32>
    %25 = math.log %24 : vector<16x128xf32>
    %c0_11 = arith.constant 0 : index
    %c0_12 = arith.constant 0 : index
    %c0_13 = arith.constant 0 : index
    %26 = vector.load %arg6[%c0_11, %c0_12, %c0_13] : memref<1x16x128xf32, #tpu.memory_space<vmem>>, vector<1x16x128xf32>
    %27 = vector.shape_cast %26 : vector<1x16x128xf32> to vector<16x128xf32>
    %28 = vector.shape_cast %25 : vector<16x128xf32> to vector<1x16x128xf32>
    tpu.vector_store %arg6[%c0_11, %c0_12, %c0_13], %28 {strides = array<i32>} : memref<1x16x128xf32, #tpu.memory_space<vmem>>, vector<1x16x128xf32>,
    return
  }
  func.func @transform_0(%arg0: i32, %arg1: i32) -> (i32, i32, i32) {
    %c0_i32 = arith.constant 0 : i32
    %c0_i32_0 = arith.constant 0 : i32
    return %arg0, %arg1, %c0_i32 : i32, i32, i32
  }
  func.func @transform_1(%arg0: i32, %arg1: i32) -> (i32, i32, i32) {
    %c1_i32 = arith.constant 1 : i32
    %0 = arith.addi %arg1, %c1_i32 : i32
    %c0_i32 = arith.constant 0 : i32
    %c0_i32_0 = arith.constant 0 : i32
    return %arg0, %0, %c0_i32 : i32, i32, i32
  }
  func.func @transform_2(%arg0: i32, %arg1: i32) -> (i32, i32) {
    %c0_i32 = arith.constant 0 : i32
    %c0_i32_0 = arith.constant 0 : i32
    %c0_i32_1 = arith.constant 0 : i32
    return %c0_i32, %c0_i32_0 : i32, i32
  }
  func.func @transform_3(%arg0: i32, %arg1: i32) -> (i32, i32) {
    %c0_i32 = arith.constant 0 : i32
    %c0_i32_0 = arith.constant 0 : i32
    %c0_i32_1 = arith.constant 0 : i32
    return %c0_i32, %c0_i32_0 : i32, i32
  }
  func.func @transform_4(%arg0: i32, %arg1: i32) -> (i32, i32, i32) {
    %c0_i32 = arith.constant 0 : i32
    %c0_i32_0 = arith.constant 0 : i32
    return %arg0, %arg1, %c0_i32 : i32, i32, i32
  }
}

module attributes {stable_mosaic.version = 11 : i64} {
  func.func @_melspec_kernel(%arg0: i32, %arg1: i32, %arg2: memref<1x16x16xf32, #tpu.memory_space<vmem>>, %arg3: memref<1x16x16xf32, #tpu.memory_space<vmem>>, %arg4: memref<64x256xbf16, #tpu.memory_space<vmem>>, %arg5: memref<128x128xbf16, #tpu.memory_space<vmem>>, %arg6: memref<1x16x128xf32, #tpu.memory_space<vmem>>) attributes {dimension_semantics = [#tpu.dimension_semantics<parallel>, #tpu.dimension_semantics<parallel>], iteration_bounds = array<i64: 2, 1>, scalar_prefetch = 0 : i64, scratch_operands = 0 : i64, tpu.core_type = #tpu.core_type<tc>, window_params = [{transform_indices = @transform_0, window_bounds = array<i64: 1, 16, 16>}, {transform_indices = @transform_1, window_bounds = array<i64: 1, 16, 16>}, {pipeline_mode = #tpu.pipeline_mode<synchronous>, transform_indices = @transform_2, window_bounds = array<i64: 64, 256>}, {pipeline_mode = #tpu.pipeline_mode<synchronous>, transform_indices = @transform_3, window_bounds = array<i64: 128, 128>}, {transform_indices = @transform_4, window_bounds = array<i64: 1, 16, 128>}]} {
    %c0 = arith.constant 0 : index
    %c0_0 = arith.constant 0 : index
    %c0_1 = arith.constant 0 : index
    %0 = vector.load %arg2[%c0, %c0_0, %c0_1] : memref<1x16x16xf32, #tpu.memory_space<vmem>>, vector<1x16x16xf32>
    %1 = vector.shape_cast %0 : vector<1x16x16xf32> to vector<16x16xf32>
    %2 = arith.truncf %1 : vector<16x16xf32> to vector<16x16xbf16>
    %c0_2 = arith.constant 0 : index
    %c0_3 = arith.constant 0 : index
    %c0_4 = arith.constant 0 : index
    %3 = vector.load %arg3[%c0_2, %c0_3, %c0_4] : memref<1x16x16xf32, #tpu.memory_space<vmem>>, vector<1x3x16xf32>
    %4 = vector.shape_cast %3 : vector<1x3x16xf32> to vector<3x16xf32>
    %5 = arith.truncf %4 : vector<3x16xf32> to vector<3x16xbf16>
    %6 = tpu.concatenate %2, %5 in 0 : vector<16x16xbf16>, vector<3x16xbf16> -> vector<19x16xbf16>
    %7 = vector.extract_strided_slice %6 {offsets = [0, 0], sizes = [16, 16], strides = [1, 1]} : vector<19x16xbf16> to vector<16x16xbf16>
    %8 = vector.extract_strided_slice %6 {offsets = [1, 0], sizes = [16, 16], strides = [1, 1]} : vector<19x16xbf16> to vector<16x16xbf16>
    %9 = vector.extract_strided_slice %6 {offsets = [2, 0], sizes = [16, 16], strides = [1, 1]} : vector<19x16xbf16> to vector<16x16xbf16>
    %10 = vector.extract_strided_slice %6 {offsets = [3, 0], sizes = [16, 16], strides = [1, 1]} : vector<19x16xbf16> to vector<16x16xbf16>
    %11 = tpu.concatenate %7, %8, %9, %10 in 1 : vector<16x16xbf16>, vector<16x16xbf16>, vector<16x16xbf16>, vector<16x16xbf16> -> vector<16x64xbf16>
    %c0_5 = arith.constant 0 : index
    %c0_6 = arith.constant 0 : index
    %12 = vector.load %arg4[%c0_5, %c0_6] : memref<64x256xbf16, #tpu.memory_space<vmem>>, vector<64x256xbf16>
    %cst = arith.constant dense<0.000000e+00> : vector<16x256xf32>
    %13 = tpu.matmul %11, %12, %cst {dimension_numbers = #tpu.dot_dimension_numbers<[1], [0], [0], [1], [0, 0, 1, 1], [], []>} : vector<16x64xbf16>, vector<64x256xbf16>, vector<16x256xf32> -> vector<16x256xf32>
    %14 = vector.extract_strided_slice %13 {offsets = [0, 0], sizes = [16, 128], strides = [1, 1]} : vector<16x256xf32> to vector<16x128xf32>
    %15 = vector.extract_strided_slice %13 {offsets = [0, 128], sizes = [16, 128], strides = [1, 1]} : vector<16x256xf32> to vector<16x128xf32>
    %16 = arith.mulf %14, %14 : vector<16x128xf32>
    %17 = arith.mulf %15, %15 : vector<16x128xf32>
    %18 = arith.addf %16, %17 : vector<16x128xf32>
    %19 = math.sqrt %18 : vector<16x128xf32>
    %20 = arith.truncf %19 : vector<16x128xf32> to vector<16x128xbf16>
    %c0_7 = arith.constant 0 : index
    %c0_8 = arith.constant 0 : index
    %21 = vector.load %arg5[%c0_7, %c0_8] : memref<128x128xbf16, #tpu.memory_space<vmem>>, vector<128x128xbf16>
    %cst_9 = arith.constant dense<0.000000e+00> : vector<16x128xf32>
    %22 = tpu.matmul %20, %21, %cst_9 {dimension_numbers = #tpu.dot_dimension_numbers<[1], [0], [0], [1], [0, 0, 1, 1], [], []>} : vector<16x128xbf16>, vector<128x128xbf16>, vector<16x128xf32> -> vector<16x128xf32>
    %cst_10 = arith.constant 9.99999974E-6 : f32
    %23 = vector.broadcast %cst_10 : f32 to vector<16x128xf32>
    %24 = arith.maximumf %22, %23 : vector<16x128xf32>
    %25 = math.log %24 : vector<16x128xf32>
    %c0_11 = arith.constant 0 : index
    %c0_12 = arith.constant 0 : index
    %c0_13 = arith.constant 0 : index
    %26 = vector.load %arg6[%c0_11, %c0_12, %c0_13] : memref<1x16x128xf32, #tpu.memory_space<vmem>>, vector<1x16x128xf32>
    %27 = vector.shape_cast %26 : vector<1x16x128xf32> to vector<16x128xf32>
    %28 = vector.shape_cast %25 : vector<16x128xf32> to vector<1x16x128xf32>
    tpu.vector_store %arg6[%c0_11, %c0_12, %c0_13], %28 {strides = array<i32>} : memref<1x16x128xf32, #tpu.memory_space<vmem>>, vector<1x16x128xf32>,
    return
  }
  func.func @transform_0(%arg0: i32, %arg1: i32) -> (i32, i32, i32) {
    %c0_i32 = arith.constant 0 : i32
    %c0_i32_0 = arith.constant 0 : i32
    return %arg0, %arg1, %c0_i32 : i32, i32, i32
  }
  func.func @transform_1(%arg0: i32, %arg1: i32) -> (i32, i32, i32) {
    %c1_i32 = arith.constant 1 : i32
    %0 = arith.addi %arg1, %c1_i32 : i32
    %c0_i32 = arith.constant 0 : i32
    %c0_i32_0 = arith.constant 0 : i32
    return %arg0, %0, %c0_i32 : i32, i32, i32
  }
  func.func @transform_2(%arg0: i32, %arg1: i32) -> (i32, i32) {
    %c0_i32 = arith.constant 0 : i32
    %c0_i32_0 = arith.constant 0 : i32
    %c0_i32_1 = arith.constant 0 : i32
    return %c0_i32, %c0_i32_0 : i32, i32
  }
  func.func @transform_3(%arg0: i32, %arg1: i32) -> (i32, i32) {
    %c0_i32 = arith.constant 0 : i32
    %c0_i32_0 = arith.constant 0 : i32
    %c0_i32_1 = arith.constant 0 : i32
    return %c0_i32, %c0_i32_0 : i32, i32
  }
  func.func @transform_4(%arg0: i32, %arg1: i32) -> (i32, i32, i32) {
    %c0_i32 = arith.constant 0 : i32
    %c0_i32_0 = arith.constant 0 : i32
    return %arg0, %arg1, %c0_i32 : i32, i32, i32
  }
}

</mosaic_0001>

<bundles_post_ra>
// kernel: tpu_custom_call.1
= control target key start
LH: loop header
LB: loop body
LE: loop exit
PB: predicated region body
PF: predicated region fallthrough
CT: control target
= control target key end

     0   :  { %9 = vsyncpa [#allocation3], 0  ;;  %s1098_s0 = inlined_call_operand.vmem [shape: f32[2,32,16], index: 0, kind: input, shape index: {}]   ;;  %s1099_s1 = inlined_call_operand.vmem [shape: f32[2,32,16], index: 1, kind: input, shape index: {}]   ;;  %s1100_s2 = inlined_call_operand.vmem [shape: bf16[64,256], index: 2, kind: input, shape index: {}]   ;;  %s1101_s3 = inlined_call_operand.vmem [shape: bf16[128,128], index: 3, kind: input, shape index: {}]   ;;  %s1102_s4 = inlined_call_operand.hbm [shape: f32[2,16,128], index: 4, kind: output, shape index: {}]  }
   0x1   :  { %11 = vsyncpa [#allocation3 + $0x1], 0  ;;  %s930_s15 = smov 0   ;;  %s932_s16 = smov 0  }
   0x2   :  { %s934_s17 = smov 0   ;;  %s936_s18 = smov 0  }
   0x3   :  { %s938_s19 = smov 0   ;;  %s940_s20 = smov 0  }
   0x4 LB: > { %s661_s21 = sadd.s32 4294967295, %s894_s20   ;;  %s662_s22 = sadd.s32 4294967294, %s894_s20   ;;  %s894_s20 = sphi %s940_s20, %s17_s20   ;;  %s890_s19 = sphi %s938_s19, %s1109_s19   ;;  %s886_s18 = sphi %s936_s18, %s1108_s18   ;;  %s882_s17 = sphi %s934_s17, %s1107_s17   ;;  %s878_s16 = sphi %s932_s16, %s1106_s16   ;;  %s874_s15 = sphi %s930_s15, %s1105_s15  }
   0x5   : > { %s29_s23 = sadd.s32 1, %s890_s19  ;;  %s138_s24 = sadd.s32 1, %s882_s17 }
   0x6   : > { %p31_p0 = scmp.ge.s32.totalorder %s29_s23, 2  ;;  %p148_p1 = scmp.ne.s32.totalorder %s882_s17, %s878_s16 }
   0x7   : > { %p149_p2 = scmp.eq.s32.totalorder %s661_s21, 1  ;;  %p154_p3 = scmp.ne.s32.totalorder %s878_s16, %s874_s15 }
   0x8   : > { %s1111_s23 = smov (%p31_p0, %s29_s23), 0  ;;  %p155_p5 = scmp.eq.s32.totalorder %s662_s22, 1 }
   0x9   : > { %p970_p4 = por %p149_p2, %p148_p1  ;;  %s133_s26 = ssub.s32 %s890_s19, %s1111_s23 }
   0xa   : > { %p665_p6 = scmp.ge.s32.totalorder %s894_s20, 1  ;;  %p136_p7 = scmp.eq.s32.totalorder %s133_s26, 0 }
   0xb   : > { %p977_p8 = por %p155_p5, %p154_p3  ;;  %p207_p9 = scmp.lt.s32.totalorder %s894_s20, 3 }
   0xc   : > { %s983_s28 = scalar_select %p136_p7, %s882_s17, %s138_s24  }
   0xd   : > { %p208_p10 = pnand %p665_p6, %p207_p9 }
   0xe   : > { %p248_p11 = scmp.lt.s32.totalorder (!%p208_p10), %s886_s18, 1  ;;  %s898_s12 = smov (!%p208_p10), 16  }
   0xf   : > { %211 = sbr.rel (%p208_p10) target bundleno = 607 (0x25f), region = 36  ;;  %s244_s21 = sand.u32 (!%p208_p10), 1, %s878_s16  }
  0x10   : > { %s666_s22 = sshll.u32 (!%p208_p10), %s244_s21, 4  ;;  %s1053_s7 = scalar_lea.sflag (!%p208_p10), [#allocation3], %s244_s21 }
  0x11   : > { %s246_s24 = scalar_lea.vmem (!%p208_p10), [#allocation2], %s666_s22 }
  0x12   : > { %s564_s26 = sshll.u32 (!%p208_p10), %s246_s24, 4  ;;  %s1046_s26 = int_to_ptr.vmem [resolvable:$true] %s564_s26 }
  0x13   : > { %s818_s8 = scalar_lea.vmem (!%p208_p10), %s1046_s26, 256 }
  0x14   : > { %s249_s29 = scalar_select %p248_p11, %s886_s18, 1  ;;  %v790_v0 = vld [vmem:[%s1100_s2 + $0x34] ss:$8 sps:$4 sm:$0xff]   ;;  %v792_v1 = vld [vmem:[%s1100_s2 + $0x30] ss:$8 sps:$4 sm:$0xff]   ;;  %vm293_vm2 = vcmask 1046528  }
  0x15   : > { %v793_v2 = vld [vmem:[%s1100_s2 + $0x24] ss:$8 sps:$4 sm:$0xff]   ;;  %vm276_vm0 = vsmask.f32 7424  ;;  %379 = vmatprep.subr.bf16.mxu0 %v790_v0  ;;  %v795_v3 = vld [vmem:[%s1100_s2 + $0x20] ss:$8 sps:$4 sm:$0xff]   ;;  %p819_p12 = scmp.ne.s32.totalorder %s1046_s26, %s818_s8 }
  0x16   : > { %s693_s10 = sshll.u32 %s249_s29, 5  ;;  %380 = vmatpush1.bf16.msra.mxu0 %v792_v1  ;;  %vm299_vm1 = vsmask.f32 6400  ;;  %v796_v6 = vld [vmem:[%s1100_s2 + $0x14] ss:$8 sps:$4 sm:$0xff]   ;;  %v896_v11 = vmov 0  }
  0x17   : > { %s255_s13 = scalar_lea.vmem %s1098_s0, %s693_s10  ;;  %s695_s14 = sadd.s32 16, %s693_s10  ;;  %381 = vmatprep.subr.bf16.mxu0 %v793_v2  ;;  %v798_v10 = vld [vmem:[%s1100_s2 + $0x10] ss:$8 sps:$4 sm:$0xff]   ;;  %403 = vmatprep.mubr.bf16.mxu0 %v896_v11  ;;  %v799_v16 = vld [vmem:[%s1100_s2 + $0x4] ss:$8 sps:$4 sm:$0xff]   ;;  %v897_v17 = vmov 0.0  }
  0x18   : > { %s266_s30 = scalar_lea.vmem %s1099_s1, %s695_s14  ;;  %v271_v4 = vld [vmem:[%s255_s13] sm:$0xff]  ;;  %v272_v5 = vld [vmem:[%s255_s13 + $0x8] sm:$0xff]  ;;  %707 = vmatprep.subr.bf16.mxu1 %v897_v17  ;;  %s899_s13 = smov 48   ;;  %vm311_vm3 = vcmask 130048   ;;  %vm314_vm4 = vcmask 261120   ;;  %vm317_vm5 = vcmask 392192  }
  0x19   : > { %v273_v7 = vpack.c.bf16 %v272_v5, %v271_v4  ;;  %v274_v8 = vld [vmem:[%s266_s30] sm:$0x7]  ;;  %s900_s14 = smov 32   ;;  %vm368_vm6 = vcmask 523264   ;;  %v802_v39 = vld [vmem:[%s1101_s3 + $0x38] sm:$0xff]   ;;  %v803_v40 = vld [vmem:[%s1101_s3 + $0x30] sm:$0xff]   ;;  %p820_p13 = pnand %p819_p12, %p970_p4 }
  0x1a   : > { %v275_v9 = vpack.c.bf16 %v274_v8, %v274_v8  ;;  %382 = vmatpush1.bf16.msra.mxu0 %v795_v3  ;;  %v801_v22 = vld [vmem:[%s1100_s2] ss:$8 sps:$4 sm:$0xff]   ;;  %708 = vmatpush3.bf16.msra.mxu1 %v802_v39  ;;  %v806_v43 = vld [vmem:[%s1101_s3 + $0x18] sm:$0xff]   ;;  %vm901_vm7 = vmmov 0   ;;  %v807_v44 = vld [vmem:[%s1101_s3 + $0x10] sm:$0xff]   ;;  %s696_s30 = sshll.u32 %s886_s18, 8 }
  0x1b   : > { %v278_v12 = vshrl.u32 %v273_v7, 16  ;;  %v280_v13 = vshll.u32 %v273_v7, 16  ;;  %383 = vmatprep.subr.bf16.mxu0 %v796_v6  ;;  %v294_v19 = vrot.slane %v273_v7, 1  ;;  %709 = vmatprep.subr.bf16.mxu1 %v897_v17  ;;  %v804_v41 = vld [vmem:[%s1101_s3 + $0x28] sm:$0xff]   ;;  %v805_v42 = vld [vmem:[%s1101_s3 + $0x20] sm:$0xff]   ;;  %s1051_s6 = scalar_lea.hbm %s1102_s4, %s696_s30  ;;  %p821_p0 = pneg %p820_p13 }
  0x1c   : > { %v285_v14 = vshll.u32 %v275_v9, 16  ;;  %v303_v15 = vshrl.u32 %v275_v9, 16  ;;  %v295_v24 = vrot.slane %v275_v9, 1  ;;  %723 = vmatprep.mubr.msk.bf16.mxu1 %vm901_vm7, %v897_v17  ;;  %v808_v45 = vld [vmem:[%s1101_s3 + $0x8] sm:$0xff]   ;;  %v809_v46 = vld [vmem:[%s1101_s3] sm:$0xff]   ;;  %s902_s18 = smov [#allocation2]  }
  0x1d   : > { %v282_v18 = vrot.slane %v280_v13, 1  ;;  %v300_v20 = vrot.slane %v278_v12, 1  ;;  %v301_v21 = vrot.slane %v280_v13, 2  ;;  %s822_s9 = sshll.u32 %s902_s18, 4  ;;  %s823_s9 = int_to_ptr.vmem [resolvable:$false] %s822_s9 }
  0x1e   : > { %v287_v23 = vrot.slane %v285_v14, 1  ;;  %v305_v25 = vrot.slane %v303_v15, 1  ;;  %v306_v26 = vrot.slane %v285_v14, 2  ;;  %384 = vmatpush1.bf16.msra.mxu0 %v798_v10  ;;  %v296_v32 = vsel %vm293_vm2, %v294_v19, %v295_v24  ;;  %710 = vmatpush3.bf16.msra.mxu1 %v803_v40  ;;  %s824_s10 = scalar_lea.vmem %s823_s9, 512  ;;  %p825_p1 = scmp.lt.s32.totalorder %s1046_s26, %s823_s9 }
  0x1f   : > { %v283_v27 = vor.u32 %v282_v18, %v278_v12  ;;  %v302_v28 = vor.u32 %v301_v21, %v300_v20  ;;  %385 = vmatprep.subr.bf16.mxu0 %v799_v16  ;;  %711 = vmatprep.subr.bf16.mxu1 %v897_v17  ;;  %p826_p2 = scmp.lt.s32.totalorder %s824_s10, %s818_s8 }
  0x20   : > { %v307_v29 = vor.u32 %v306_v26, %v305_v25 }
  0x21   : > { %v288_v30 = vsel %vm276_vm0, %v283_v27, %v287_v23  ;;  %p827_p3 = por %p826_p2, %p825_p1 }
  0x22   : > { %289 = vrot.lane.b32.xlu0 %v288_v30, %s898_s12  ;;  %v308_v31 = vsel %vm299_vm1, %v302_v28, %v307_v29  ;;  %386 = vmatpush1.bf16.msra.mxu0 %v801_v22 }
  0x23   : > { %309 = vrot.lane.b32.xlu1 %v308_v31, %s899_s13  ;;  %712 = vmatpush3.bf16.msra.mxu1 %v804_v41  ;;  %p828_p5 = pnand %p827_p3, %p821_p0 }
  0x24   : > { %713 = vmatprep.subr.bf16.mxu1 %v897_v17 }
  0x26   : > { %297 = vrot.lane.b32.xlu0 %v296_v32, %s900_s14 }
  0x27   : > { %714 = vmatpush3.bf16.msra.mxu1 %v805_v42 }
  0x28   : > { %715 = vmatprep.subr.bf16.mxu1 %v897_v17 }
  0x2b   : > { %716 = vmatpush3.bf16.msra.mxu1 %v806_v43 }
  0x2c   : > { %717 = vmatprep.subr.bf16.mxu1 %v897_v17 }
  0x2f   : > { %718 = vmatpush3.bf16.msra.mxu1 %v807_v44 }
  0x30   : > { %719 = vmatprep.subr.bf16.mxu1 %v897_v17 }
  0x33   : > { %720 = vmatpush3.bf16.msra.mxu1 %v808_v45 }
  0x34   : > { %721 = vmatprep.subr.bf16.mxu1 %v897_v17 }
  0x37   : > { %722 = vmatpush3.bf16.msra.mxu1 %v809_v46 }
  0x94   : > { %v290_v33 = vpop.permute.xlu0 %289 }
  0x95   : > { %v310_v34 = vpop.permute.xlu1 %309  ;;  %v313_v35 = vsel %vm311_vm3, %v273_v7, %v290_v33 }
  0x98   : > { %v298_v36 = vpop.permute.xlu0 %297 }
  0x99   : > { %v316_v37 = vsel %vm314_vm4, %v313_v35, %v298_v36 }
  0x9a   : > { %v319_v38 = vsel %vm317_vm5, %v316_v37, %v310_v34 }
  0x9b   : > { %679 = vmatmul.mubr.msk.bf16.vlgmr.msra.gmra.mxu0 %vm368_vm6, %v319_v38 }
 0x15b   : > { %v405_v47 = vpop.f32.mrf.mxu0 }
 0x15c   : > { %v414_v49 = vmul.f32 %v405_v47, %v405_v47 }
 0x15d   : > { %v407_v48 = vpop.f32.mrf.mxu0 }
 0x15e   : > { %v416_v50 = vmul.f32 %v407_v48, %v407_v48 }
 0x15f   : > { %v409_v51 = vpop.f32.mrf.mxu0 }
 0x160   : > { %v418_v52 = vadd.f32 %v416_v50, %v414_v49  ;;  %v415_v54 = vmul.f32 %v409_v51, %v409_v51 }
 0x161   : > { %v411_v53 = vpop.f32.mrf.mxu0 }
 0x162   : > { %810 = vrsqrt.f32 %v418_v52  ;;  %v417_v55 = vmul.f32 %v411_v53, %v411_v53  ;;  %vm422_vm8 = vcmp.eq.f32.partialorder %v418_v52, inf  ;;  %v425_v62 = vand.u32 2147483648, %v418_v52 }
 0x163   : > { %vm424_vm10 = vcmp.eq.f32.partialorder %v418_v52, 0.0 }
 0x164   : > { %v419_v56 = vadd.f32 %v417_v55, %v415_v54 }
 0x166   : > { %812 = vrsqrt.f32 %v419_v56  ;;  %vm429_vm9 = vcmp.eq.f32.partialorder %v419_v56, inf  ;;  %v432_v63 = vand.u32 2147483648, %v419_v56  ;;  %vm431_vm11 = vcmp.eq.f32.partialorder %v419_v56, 0.0 }
 0x16f   : > { %v811_v57 = vpop.eup %810 }
 0x170   : > { %v421_v58 = vmul.f32 %v811_v57, %v418_v52 }
 0x172   : > { %v423_v60 = vsel %vm422_vm8, %v418_v52, %v421_v58 }
 0x173   : > { %v813_v59 = vpop.eup %812  ;;  %v426_v1 = vsel %vm424_vm10, %v425_v62, %v423_v60 }
 0x174   : > { %v428_v61 = vmul.f32 %v813_v59, %v419_v56 }
 0x176   : > { %v430_v0 = vsel %vm429_vm9, %v419_v56, %v428_v61 }
 0x177   : > { %v433_v2 = vsel %vm431_vm11, %v432_v63, %v430_v0 }
 0x178   : > { %v434_v3 = vpack.c.bf16 %v433_v2, %v426_v1 }
 0x17a   : > { %724 = vmatmul.mubr.bf16.vlgmr.msra.gmra.mxu1 %v434_v3 }
 0x23a   : > { %v533_v4 = vpop.f32.mrf.mxu1 }
 0x23b   : > { %v540_v5 = vmax.f32 %v533_v4, 1e-05 }
 0x23c   : > { %v725_v6 = vpop.f32.mrf.mxu1 }
 0x23d   : > { %814 = vlog2.f32 %v540_v5 }
 0x23e   : > { %v536_v7 = vpop.f32.mrf.mxu1 }
 0x23f   : > { %v541_v8 = vmax.f32 %v536_v7, 1e-05 }
 0x240   : > { %v726_v9 = vpop.f32.mrf.mxu1 }
 0x241   : > { %816 = vlog2.f32 %v541_v8 }
 0x24a   : > { %v815_v10 = vpop.eup %814 }
 0x24b   : > { %v543_v11 = vmul.f32 0.6931472, %v815_v10 }
 0x24d   : > { %546 = vst [vmem:[%s246_s24] sm:$0xff] %v543_v11 }
 0x24e   : > { %v817_v12 = vpop.eup %816 }
 0x24f   : > { %v545_v13 = vmul.f32 0.6931472, %v817_v12 }
 0x251   : > { %547 = vst [vmem:[%s246_s24 + $0x8] sm:$0xff] %v545_v13 }
 0x252   : > { %831 = shalt.err (!%p828_p5)
}
 0x253   : > { %s832_s11 = scalar_lea.hbm %s1051_s6, 256  ;;  %s836_s14 = scalar_lea.hbm %s1102_s4, 512 }
 0x254   : > { %p833_p6 = scmp.ne.s32.totalorder %s1051_s6, %s832_s11  ;;  %p837_p10 = scmp.lt.s32.totalorder %s1051_s6, %s1102_s4 }
 0x255   : > { %p838_p11 = scmp.lt.s32.totalorder %s836_s14, %s832_s11 }
 0x256   : > { %p834_p7 = pnand %p833_p6, %p970_p4 }
 0x257   : > { %p839_p12 = por %p838_p11, %p837_p10 }
 0x258   : > { %p835_p9 = pneg %p834_p7 }
 0x25a   : > { %p840_p13 = pnand %p839_p12, %p835_p9 }
 0x25c   : > { %843 = shalt.err (!%p840_p13)
}
 0x25d   : > { %s903_s24 = smov 128   ;;  %s904_s30 = smov 8  }
 0x25e   : > { %727 = dma.vmem_to_hbm [thread:$0]  (%p970_p4), %s1046_s26, 256, %s1051_s6, %s1053_s7, %s903_s24, %s903_s24, %s904_s30  }
 0x25f PF: > { %p733_p0 = scmp.ge.s32.totalorder %s894_s20, 2  ;;  %s579_s29 = sand.u32 1, %s874_s15  }
 0x260   : > { %s580_s5 = scalar_lea.sflag [#allocation3], %s579_s29 }
 0x261   : > { %p730_p1 = pnand %p733_p0, %p977_p8 }
 0x263   : > { %p731_p2 = pneg %p730_p1 }
 0x265   : > { %869 = dma.done.wait (%p731_p2), %s580_s5, 256  }
 0x266   : > { %871 = vsyncadd (%p731_p2), %s580_s5, 4294967040  ;;  %s17_s20 = sadd.s32 1, %s894_s20   ;;  %s1105_s15 = smov %s878_s16 }
 0x267   : > { %p14_p3 = scmp.ge.s32.totalorder %s17_s20, 4   ;;  %s1106_s16 = smov %s882_s17 }
 0x268   : > { %s1107_s17 = smov %s983_s28  ;;  %s1108_s18 = smov %s890_s19 }
 0x269   : > { %s1109_s19 = smov %s1111_s23  ;;  %16 = sbr.rel (!%p14_p3) target bundleno = 4 (0x4), region = 74 }
 0x26e   :  { %585 = vsyncpa [#allocation3], 1 }
 0x26f   :  { %587 = vsyncpa [#allocation3 + $0x1], 1 }

// kernel: tpu_custom_call.1
= control target key start
LH: loop header
LB: loop body
LE: loop exit
PB: predicated region body
PF: predicated region fallthrough
CT: control target
= control target key end

     0   :  { %9 = vsyncpa [#allocation3], 0  ;;  %s1098_s0 = inlined_call_operand.vmem [shape: f32[2,32,16], index: 0, kind: input, shape index: {}]   ;;  %s1099_s1 = inlined_call_operand.vmem [shape: f32[2,32,16], index: 1, kind: input, shape index: {}]   ;;  %s1100_s2 = inlined_call_operand.vmem [shape: bf16[64,256], index: 2, kind: input, shape index: {}]   ;;  %s1101_s3 = inlined_call_operand.vmem [shape: bf16[128,128], index: 3, kind: input, shape index: {}]   ;;  %s1102_s4 = inlined_call_operand.hbm [shape: f32[2,16,128], index: 4, kind: output, shape index: {}]  }
   0x1   :  { %11 = vsyncpa [#allocation3 + $0x1], 0  ;;  %s930_s15 = smov 0   ;;  %s932_s16 = smov 0  }
   0x2   :  { %s934_s17 = smov 0   ;;  %s936_s18 = smov 0  }
   0x3   :  { %s938_s19 = smov 0   ;;  %s940_s20 = smov 0  }
   0x4 LB: > { %s661_s21 = sadd.s32 4294967295, %s894_s20   ;;  %s662_s22 = sadd.s32 4294967294, %s894_s20   ;;  %s894_s20 = sphi %s940_s20, %s17_s20   ;;  %s890_s19 = sphi %s938_s19, %s1109_s19   ;;  %s886_s18 = sphi %s936_s18, %s1108_s18   ;;  %s882_s17 = sphi %s934_s17, %s1107_s17   ;;  %s878_s16 = sphi %s932_s16, %s1106_s16   ;;  %s874_s15 = sphi %s930_s15, %s1105_s15  }
   0x5   : > { %s29_s23 = sadd.s32 1, %s890_s19  ;;  %s138_s24 = sadd.s32 1, %s882_s17 }
   0x6   : > { %p31_p0 = scmp.ge.s32.totalorder %s29_s23, 2  ;;  %p148_p1 = scmp.ne.s32.totalorder %s882_s17, %s878_s16 }
   0x7   : > { %p149_p2 = scmp.eq.s32.totalorder %s661_s21, 1  ;;  %p154_p3 = scmp.ne.s32.totalorder %s878_s16, %s874_s15 }
   0x8   : > { %s1111_s23 = smov (%p31_p0, %s29_s23), 0  ;;  %p155_p5 = scmp.eq.s32.totalorder %s662_s22, 1 }
   0x9   : > { %p970_p4 = por %p149_p2, %p148_p1  ;;  %s133_s26 = ssub.s32 %s890_s19, %s1111_s23 }
   0xa   : > { %p665_p6 = scmp.ge.s32.totalorder %s894_s20, 1  ;;  %p136_p7 = scmp.eq.s32.totalorder %s133_s26, 0 }
   0xb   : > { %p977_p8 = por %p155_p5, %p154_p3  ;;  %p207_p9 = scmp.lt.s32.totalorder %s894_s20, 3 }
   0xc   : > { %s983_s28 = scalar_select %p136_p7, %s882_s17, %s138_s24  }
   0xd   : > { %p208_p10 = pnand %p665_p6, %p207_p9 }
   0xe   : > { %p248_p11 = scmp.lt.s32.totalorder (!%p208_p10), %s886_s18, 1  ;;  %s898_s12 = smov (!%p208_p10), 16  }
   0xf   : > { %211 = sbr.rel (%p208_p10) target bundleno = 607 (0x25f), region = 36  ;;  %s244_s21 = sand.u32 (!%p208_p10), 1, %s878_s16  }
  0x10   : > { %s666_s22 = sshll.u32 (!%p208_p10), %s244_s21, 4  ;;  %s1053_s7 = scalar_lea.sflag (!%p208_p10), [#allocation3], %s244_s21 }
  0x11   : > { %s246_s24 = scalar_lea.vmem (!%p208_p10), [#allocation2], %s666_s22 }
  0x12   : > { %s564_s26 = sshll.u32 (!%p208_p10), %s246_s24, 4  ;;  %s1046_s26 = int_to_ptr.vmem [resolvable:$true] %s564_s26 }
  0x13   : > { %s818_s8 = scalar_lea.vmem (!%p208_p10), %s1046_s26, 256 }
  0x14   : > { %s249_s29 = scalar_select %p248_p11, %s886_s18, 1  ;;  %v790_v0 = vld [vmem:[%s1100_s2 + $0x34] ss:$8 sps:$4 sm:$0xff]   ;;  %v792_v1 = vld [vmem:[%s1100_s2 + $0x30] ss:$8 sps:$4 sm:$0xff]   ;;  %vm293_vm2 = vcmask 1046528  }
  0x15   : > { %v793_v2 = vld [vmem:[%s1100_s2 + $0x24] ss:$8 sps:$4 sm:$0xff]   ;;  %vm276_vm0 = vsmask.f32 7424  ;;  %379 = vmatprep.subr.bf16.mxu0 %v790_v0  ;;  %v795_v3 = vld [vmem:[%s1100_s2 + $0x20] ss:$8 sps:$4 sm:$0xff]   ;;  %p819_p12 = scmp.ne.s32.totalorder %s1046_s26, %s818_s8 }
  0x16   : > { %s693_s10 = sshll.u32 %s249_s29, 5  ;;  %380 = vmatpush1.bf16.msra.mxu0 %v792_v1  ;;  %vm299_vm1 = vsmask.f32 6400  ;;  %v796_v6 = vld [vmem:[%s1100_s2 + $0x14] ss:$8 sps:$4 sm:$0xff]   ;;  %v896_v11 = vmov 0  }
  0x17   : > { %s255_s13 = scalar_lea.vmem %s1098_s0, %s693_s10  ;;  %s695_s14 = sadd.s32 16, %s693_s10  ;;  %381 = vmatprep.subr.bf16.mxu0 %v793_v2  ;;  %v798_v10 = vld [vmem:[%s1100_s2 + $0x10] ss:$8 sps:$4 sm:$0xff]   ;;  %403 = vmatprep.mubr.bf16.mxu0 %v896_v11  ;;  %v799_v16 = vld [vmem:[%s1100_s2 + $0x4] ss:$8 sps:$4 sm:$0xff]   ;;  %v897_v17 = vmov 0.0  }
  0x18   : > { %s266_s30 = scalar_lea.vmem %s1099_s1, %s695_s14  ;;  %v271_v4 = vld [vmem:[%s255_s13] sm:$0xff]  ;;  %v272_v5 = vld [vmem:[%s255_s13 + $0x8] sm:$0xff]  ;;  %707 = vmatprep.subr.bf16.mxu1 %v897_v17  ;;  %s899_s13 = smov 48   ;;  %vm311_vm3 = vcmask 130048   ;;  %vm314_vm4 = vcmask 261120   ;;  %vm317_vm5 = vcmask 392192  }
  0x19   : > { %v273_v7 = vpack.c.bf16 %v272_v5, %v271_v4  ;;  %v274_v8 = vld [vmem:[%s266_s30] sm:$0x7]  ;;  %s900_s14 = smov 32   ;;  %vm368_vm6 = vcmask 523264   ;;  %v802_v39 = vld [vmem:[%s1101_s3 + $0x38] sm:$0xff]   ;;  %v803_v40 = vld [vmem:[%s1101_s3 + $0x30] sm:$0xff]   ;;  %p820_p13 = pnand %p819_p12, %p970_p4 }
  0x1a   : > { %v275_v9 = vpack.c.bf16 %v274_v8, %v274_v8  ;;  %382 = vmatpush1.bf16.msra.mxu0 %v795_v3  ;;  %v801_v22 = vld [vmem:[%s1100_s2] ss:$8 sps:$4 sm:$0xff]   ;;  %708 = vmatpush3.bf16.msra.mxu1 %v802_v39  ;;  %v806_v43 = vld [vmem:[%s1101_s3 + $0x18] sm:$0xff]   ;;  %vm901_vm7 = vmmov 0   ;;  %v807_v44 = vld [vmem:[%s1101_s3 + $0x10] sm:$0xff]   ;;  %s696_s30 = sshll.u32 %s886_s18, 8 }
  0x1b   : > { %v278_v12 = vshrl.u32 %v273_v7, 16  ;;  %v280_v13 = vshll.u32 %v273_v7, 16  ;;  %383 = vmatprep.subr.bf16.mxu0 %v796_v6  ;;  %v294_v19 = vrot.slane %v273_v7, 1  ;;  %709 = vmatprep.subr.bf16.mxu1 %v897_v17  ;;  %v804_v41 = vld [vmem:[%s1101_s3 + $0x28] sm:$0xff]   ;;  %v805_v42 = vld [vmem:[%s1101_s3 + $0x20] sm:$0xff]   ;;  %s1051_s6 = scalar_lea.hbm %s1102_s4, %s696_s30  ;;  %p821_p0 = pneg %p820_p13 }
  0x1c   : > { %v285_v14 = vshll.u32 %v275_v9, 16  ;;  %v303_v15 = vshrl.u32 %v275_v9, 16  ;;  %v295_v24 = vrot.slane %v275_v9, 1  ;;  %723 = vmatprep.mubr.msk.bf16.mxu1 %vm901_vm7, %v897_v17  ;;  %v808_v45 = vld [vmem:[%s1101_s3 + $0x8] sm:$0xff]   ;;  %v809_v46 = vld [vmem:[%s1101_s3] sm:$0xff]   ;;  %s902_s18 = smov [#allocation2]  }
  0x1d   : > { %v282_v18 = vrot.slane %v280_v13, 1  ;;  %v300_v20 = vrot.slane %v278_v12, 1  ;;  %v301_v21 = vrot.slane %v280_v13, 2  ;;  %s822_s9 = sshll.u32 %s902_s18, 4  ;;  %s823_s9 = int_to_ptr.vmem [resolvable:$false] %s822_s9 }
  0x1e   : > { %v287_v23 = vrot.slane %v285_v14, 1  ;;  %v305_v25 = vrot.slane %v303_v15, 1  ;;  %v306_v26 = vrot.slane %v285_v14, 2  ;;  %384 = vmatpush1.bf16.msra.mxu0 %v798_v10  ;;  %v296_v32 = vsel %vm293_vm2, %v294_v19, %v295_v24  ;;  %710 = vmatpush3.bf16.msra.mxu1 %v803_v40  ;;  %s824_s10 = scalar_lea.vmem %s823_s9, 512  ;;  %p825_p1 = scmp.lt.s32.totalorder %s1046_s26, %s823_s9 }
  0x1f   : > { %v283_v27 = vor.u32 %v282_v18, %v278_v12  ;;  %v302_v28 = vor.u32 %v301_v21, %v300_v20  ;;  %385 = vmatprep.subr.bf16.mxu0 %v799_v16  ;;  %711 = vmatprep.subr.bf16.mxu1 %v897_v17  ;;  %p826_p2 = scmp.lt.s32.totalorder %s824_s10, %s818_s8 }
  0x20   : > { %v307_v29 = vor.u32 %v306_v26, %v305_v25 }
  0x21   : > { %v288_v30 = vsel %vm276_vm0, %v283_v27, %v287_v23  ;;  %p827_p3 = por %p826_p2, %p825_p1 }
  0x22   : > { %289 = vrot.lane.b32.xlu0 %v288_v30, %s898_s12  ;;  %v308_v31 = vsel %vm299_vm1, %v302_v28, %v307_v29  ;;  %386 = vmatpush1.bf16.msra.mxu0 %v801_v22 }
  0x23   : > { %309 = vrot.lane.b32.xlu1 %v308_v31, %s899_s13  ;;  %712 = vmatpush3.bf16.msra.mxu1 %v804_v41  ;;  %p828_p5 = pnand %p827_p3, %p821_p0 }
  0x24   : > { %713 = vmatprep.subr.bf16.mxu1 %v897_v17 }
  0x26   : > { %297 = vrot.lane.b32.xlu0 %v296_v32, %s900_s14 }
  0x27   : > { %714 = vmatpush3.bf16.msra.mxu1 %v805_v42 }
  0x28   : > { %715 = vmatprep.subr.bf16.mxu1 %v897_v17 }
  0x2b   : > { %716 = vmatpush3.bf16.msra.mxu1 %v806_v43 }
  0x2c   : > { %717 = vmatprep.subr.bf16.mxu1 %v897_v17 }
  0x2f   : > { %718 = vmatpush3.bf16.msra.mxu1 %v807_v44 }
  0x30   : > { %719 = vmatprep.subr.bf16.mxu1 %v897_v17 }
  0x33   : > { %720 = vmatpush3.bf16.msra.mxu1 %v808_v45 }
  0x34   : > { %721 = vmatprep.subr.bf16.mxu1 %v897_v17 }
  0x37   : > { %722 = vmatpush3.bf16.msra.mxu1 %v809_v46 }
  0x94   : > { %v290_v33 = vpop.permute.xlu0 %289 }
  0x95   : > { %v310_v34 = vpop.permute.xlu1 %309  ;;  %v313_v35 = vsel %vm311_vm3, %v273_v7, %v290_v33 }
  0x98   : > { %v298_v36 = vpop.permute.xlu0 %297 }
  0x99   : > { %v316_v37 = vsel %vm314_vm4, %v313_v35, %v298_v36 }
  0x9a   : > { %v319_v38 = vsel %vm317_vm5, %v316_v37, %v310_v34 }
  0x9b   : > { %679 = vmatmul.mubr.msk.bf16.vlgmr.msra.gmra.mxu0 %vm368_vm6, %v319_v38 }
 0x15b   : > { %v405_v47 = vpop.f32.mrf.mxu0 }
 0x15c   : > { %v414_v49 = vmul.f32 %v405_v47, %v405_v47 }
 0x15d   : > { %v407_v48 = vpop.f32.mrf.mxu0 }
 0x15e   : > { %v416_v50 = vmul.f32 %v407_v48, %v407_v48 }
 0x15f   : > { %v409_v51 = vpop.f32.mrf.mxu0 }
 0x160   : > { %v418_v52 = vadd.f32 %v416_v50, %v414_v49  ;;  %v415_v54 = vmul.f32 %v409_v51, %v409_v51 }
 0x161   : > { %v411_v53 = vpop.f32.mrf.mxu0 }
 0x162   : > { %810 = vrsqrt.f32 %v418_v52  ;;  %v417_v55 = vmul.f32 %v411_v53, %v411_v53  ;;  %vm422_vm8 = vcmp.eq.f32.partialorder %v418_v52, inf  ;;  %v425_v62 = vand.u32 2147483648, %v418_v52 }
 0x163   : > { %vm424_vm10 = vcmp.eq.f32.partialorder %v418_v52, 0.0 }
 0x164   : > { %v419_v56 = vadd.f32 %v417_v55, %v415_v54 }
 0x166   : > { %812 = vrsqrt.f32 %v419_v56  ;;  %vm429_vm9 = vcmp.eq.f32.partialorder %v419_v56, inf  ;;  %v432_v63 = vand.u32 2147483648, %v419_v56  ;;  %vm431_vm11 = vcmp.eq.f32.partialorder %v419_v56, 0.0 }
 0x16f   : > { %v811_v57 = vpop.eup %810 }
 0x170   : > { %v421_v58 = vmul.f32 %v811_v57, %v418_v52 }
 0x172   : > { %v423_v60 = vsel %vm422_vm8, %v418_v52, %v421_v58 }
 0x173   : > { %v813_v59 = vpop.eup %812  ;;  %v426_v1 = vsel %vm424_vm10, %v425_v62, %v423_v60 }
 0x174   : > { %v428_v61 = vmul.f32 %v813_v59, %v419_v56 }
 0x176   : > { %v430_v0 = vsel %vm429_vm9, %v419_v56, %v428_v61 }
 0x177   : > { %v433_v2 = vsel %vm431_vm11, %v432_v63, %v430_v0 }
 0x178   : > { %v434_v3 = vpack.c.bf16 %v433_v2, %v426_v1 }
 0x17a   : > { %724 = vmatmul.mubr.bf16.vlgmr.msra.gmra.mxu1 %v434_v3 }
 0x23a   : > { %v533_v4 = vpop.f32.mrf.mxu1 }
 0x23b   : > { %v540_v5 = vmax.f32 %v533_v4, 1e-05 }
 0x23c   : > { %v725_v6 = vpop.f32.mrf.mxu1 }
 0x23d   : > { %814 = vlog2.f32 %v540_v5 }
 0x23e   : > { %v536_v7 = vpop.f32.mrf.mxu1 }
 0x23f   : > { %v541_v8 = vmax.f32 %v536_v7, 1e-05 }
 0x240   : > { %v726_v9 = vpop.f32.mrf.mxu1 }
 0x241   : > { %816 = vlog2.f32 %v541_v8 }
 0x24a   : > { %v815_v10 = vpop.eup %814 }
 0x24b   : > { %v543_v11 = vmul.f32 0.6931472, %v815_v10 }
 0x24d   : > { %546 = vst [vmem:[%s246_s24] sm:$0xff] %v543_v11 }
 0x24e   : > { %v817_v12 = vpop.eup %816 }
 0x24f   : > { %v545_v13 = vmul.f32 0.6931472, %v817_v12 }
 0x251   : > { %547 = vst [vmem:[%s246_s24 + $0x8] sm:$0xff] %v545_v13 }
 0x252   : > { %831 = shalt.err (!%p828_p5)
}
 0x253   : > { %s832_s11 = scalar_lea.hbm %s1051_s6, 256  ;;  %s836_s14 = scalar_lea.hbm %s1102_s4, 512 }
 0x254   : > { %p833_p6 = scmp.ne.s32.totalorder %s1051_s6, %s832_s11  ;;  %p837_p10 = scmp.lt.s32.totalorder %s1051_s6, %s1102_s4 }
 0x255   : > { %p838_p11 = scmp.lt.s32.totalorder %s836_s14, %s832_s11 }
 0x256   : > { %p834_p7 = pnand %p833_p6, %p970_p4 }
 0x257   : > { %p839_p12 = por %p838_p11, %p837_p10 }
 0x258   : > { %p835_p9 = pneg %p834_p7 }
 0x25a   : > { %p840_p13 = pnand %p839_p12, %p835_p9 }
 0x25c   : > { %843 = shalt.err (!%p840_p13)
}
 0x25d   : > { %s903_s24 = smov 128   ;;  %s904_s30 = smov 8  }
 0x25e   : > { %727 = dma.vmem_to_hbm [thread:$0]  (%p970_p4), %s1046_s26, 256, %s1051_s6, %s1053_s7, %s903_s24, %s903_s24, %s904_s30  }
 0x25f PF: > { %p733_p0 = scmp.ge.s32.totalorder %s894_s20, 2  ;;  %s579_s29 = sand.u32 1, %s874_s15  }
 0x260   : > { %s580_s5 = scalar_lea.sflag [#allocation3], %s579_s29 }
 0x261   : > { %p730_p1 = pnand %p733_p0, %p977_p8 }
 0x263   : > { %p731_p2 = pneg %p730_p1 }
 0x265   : > { %869 = dma.done.wait (%p731_p2), %s580_s5, 256  }
 0x266   : > { %871 = vsyncadd (%p731_p2), %s580_s5, 4294967040  ;;  %s17_s20 = sadd.s32 1, %s894_s20   ;;  %s1105_s15 = smov %s878_s16 }
 0x267   : > { %p14_p3 = scmp.ge.s32.totalorder %s17_s20, 4   ;;  %s1106_s16 = smov %s882_s17 }
 0x268   : > { %s1107_s17 = smov %s983_s28  ;;  %s1108_s18 = smov %s890_s19 }
 0x269   : > { %s1109_s19 = smov %s1111_s23  ;;  %16 = sbr.rel (!%p14_p3) target bundleno = 4 (0x4), region = 74 }
 0x26e   :  { %585 = vsyncpa [#allocation3], 1 }
 0x26f   :  { %587 = vsyncpa [#allocation3 + $0x1], 1 }

</bundles_post_ra>
